<compile_context>
chip_gen: v7x
topology: tpu7x:2x2x1
jax: 0.10.0
libtpu: 0.0.40
codegen_flags: <defaults>
</compile_context>

<pallas_src>
import functools

import jax
import jax.numpy as jnp
from jax.experimental import pallas as pl
from jax.experimental.pallas import tpu as pltpu

LN_EPS = 1e-5
SUBLANE = 8  # f32 sublane width


def _round_up(n, m):
    return ((n + m - 1) // m) * m


def _cdiv(a, b):
    return -(-a // b)


def _block(h, w, gamma, beta, matmul_dtype):
    """Linear(bias=False) -> LayerNorm -> Tanh on an unpadded (tile, d) slab.

    Matmul inputs are cast to `matmul_dtype` (bf16 by default) for the MXU;
    accumulation and all LayerNorm / tanh math stay in f32.
    """
    y = jnp.dot(h.astype(matmul_dtype), w.astype(matmul_dtype),
                preferred_element_type=jnp.float32)          # (tile, d) f32
    mean = jnp.mean(y, axis=-1, keepdims=True)
    centered = y - mean
    var = jnp.mean(centered * centered, axis=-1, keepdims=True)   # biased (PyTorch LN)
    y_hat = centered * jax.lax.rsqrt(var + LN_EPS)                # reuse `centered`
    return jnp.tanh(y_hat * gamma + beta)


def _generator_kernel(x_ref,
                      w0_ref, g0_ref, b0_ref,
                      w1_ref, g1_ref, b1_ref,
                      w2_ref, g2_ref, b2_ref,
                      o_ref, *, matmul_dtype):
    x = x_ref[...].astype(jnp.float32)
    h = _block(x, w0_ref[...], g0_ref[...], b0_ref[...], matmul_dtype) + x
    h = _block(h, w1_ref[...], g1_ref[...], b1_ref[...], matmul_dtype) + h
    h = _block(h, w2_ref[...], g2_ref[...], b2_ref[...], matmul_dtype)
    o_ref[...] = h.astype(o_ref.dtype)


def prepare_params(params):
    """One-time parameter prep (hoisted out of the per-call path).

    Transposes PyTorch-style (out, in) weights to (in, out) and reshapes LN
    gamma/beta to (1, d) rows.  Call once, reuse across forward calls.
    """
    def prep(block):
        w, g, b = block
        return (jnp.asarray(w, jnp.float32).T,
                jnp.asarray(g, jnp.float32).reshape(1, -1),
                jnp.asarray(b, jnp.float32).reshape(1, -1))
    return {k: prep(v) for k, v in params.items()}


def generator_forward(x, prepared, *, batch_tile=2048, matmul_dtype=jnp.bfloat16):
    """x: (B, input_dim) f32.  prepared: output of prepare_params().

    Any batch size B is accepted; the batch is tiled into sublane-rounded
    tiles (>= 2 grid steps when B allows, so v7x's two TensorCores both work).
    Feature dims are NOT padded in HBM — blocks use the true d_in / d_out.
    """
    B, d_in = x.shape
    w0, g0, b0 = prepared["block_0"]
    w1, g1, b1 = prepared["block_1"]
    w2, g2, b2 = prepared["block_2"]
    d_out = w2.shape[1]

    # Batch tile: big enough to amortize ~0.35us/step grid overhead, small
    # enough that small batches still split into >= 2 parallel steps (v7x TCs).
    tile = min(_round_up(batch_tile, SUBLANE),
               max(SUBLANE, _round_up(_cdiv(B, 2), SUBLANE)))
    B_p = _round_up(B, tile)
    grid = (B_p // tile,)

    x_f32 = x.astype(jnp.float32)
    x_p = x_f32 if B_p == B else jnp.pad(x_f32, ((0, B_p - B), (0, 0)))

    def rep(arr):
        # Full-array, block-index-constant (resident) spec.  The block never
        # changes across the grid, so single-buffer it (saves VMEM on v7x).
        return pl.BlockSpec(arr.shape, lambda i: (0, 0),
                            pipeline_mode=pl.Buffered(1))

    itemsize = 4
    act_bytes = tile * (d_in + d_out) * itemsize                 # one x tile + one out tile
    param_bytes = (w0.size + w1.size + w2.size
                   + g0.size + b0.size + g1.size + b1.size
                   + g2.size + b2.size) * itemsize
    # Double-buffered activation tiles + single-buffered resident params
    # + headroom for compiler-internal scratch; cap well below v7x's 64 MiB.
    needed = 2 * 2 * act_bytes + param_bytes + (4 << 20)
    vmem_limit = int(min(48 << 20, max(needed, 16 << 20)))

    flops = 2 * B_p * d_in * (2 * d_in + d_out)
    transcendentals = B_p * (2 * d_in + d_out + 3)               # tanh + per-row rsqrt
    bytes_accessed = B_p * (d_in + d_out) * itemsize + param_bytes

    kernel = functools.partial(_generator_kernel, matmul_dtype=matmul_dtype)

    out_p = pl.pallas_call(
        kernel,
        out_shape=jax.ShapeDtypeStruct((B_p, d_out), x.dtype),
        grid_spec=pltpu.PrefetchScalarGridSpec(
            num_scalar_prefetch=0,
            grid=grid,
            in_specs=[
                pl.BlockSpec((tile, d_in), lambda i: (i, 0)),    # x tile (batch-tiled)
                rep(w0), rep(g0), rep(b0),
                rep(w1), rep(g1), rep(b1),
                rep(w2), rep(g2), rep(b2),
            ],
            out_specs=pl.BlockSpec((tile, d_out), lambda i: (i, 0)),
        ),
        compiler_params=pltpu.CompilerParams(
            dimension_semantics=("parallel",),
            vmem_limit_bytes=vmem_limit,
        ),
        cost_estimate=pl.CostEstimate(
            flops=flops,
            transcendentals=transcendentals,
            bytes_accessed=bytes_accessed,
        ),
    )(x_p, w0, g0, b0, w1, g1, b1, w2, g2, b2)

    return out_p if B_p == B else out_p[:B]


def _reference_forward(x, params):
    """Pure-JAX reference mirroring the PyTorch module (binary=True)."""
    def block(h, w, g, b):
        y = h @ w.T
        mean = jnp.mean(y, axis=-1, keepdims=True)
        var = jnp.mean(jnp.square(y - mean), axis=-1, keepdims=True)
        return jnp.tanh((y - mean) / jnp.sqrt(var + LN_EPS) * g + b)

    w0, g0, b0 = params["block_0"]
    w1, g1, b1 = params["block_1"]
    w2, g2, b2 = params["block_2"]
    h = block(x, w0, g0, b0) + x
    h = block(h, w1, g1, b1) + h
    return block(h, w2, g2, b2)


def init_params(key, input_dim, output_dim):
    """Deterministic synthetic parameters (shapes match nn.Linear / nn.LayerNorm)."""
    k0, k1, k2 = jax.random.split(key, 3)

    def linear_w(k, out_d, in_d):
        bound = 1.0 / jnp.sqrt(in_d)
        return jax.random.uniform(k, (out_d, in_d), jnp.float32, -bound, bound)

    def ln(dim):
        # Non-trivial gamma/beta so the affine path is actually exercised.
        return (jnp.linspace(0.5, 1.5, dim, dtype=jnp.float32),
                jnp.linspace(-0.1, 0.1, dim, dtype=jnp.float32))

    g0, b0 = ln(input_dim)
    g1, b1 = ln(input_dim)
    g2, b2 = ln(output_dim)
    return {
        "block_0": (linear_w(k0, input_dim, input_dim), g0, b0),
        "block_1": (linear_w(k1, input_dim, input_dim), g1, b1),
        "block_2": (linear_w(k2, output_dim, input_dim), g2, b2),
    }
    # TODO(synk): binary=False (LeakyReLU 0.2) variant of the module is not implemented.


if __name__ == "__main__":
    key = jax.random.PRNGKey(0)
    k_x, k_x2, k_p = jax.random.split(key, 3)

    input_dim, output_dim = 32, 16
    raw_params = init_params(k_p, input_dim, output_dim)
    params = prepare_params(raw_params)        # one-time weight prep, reused below

    # Small demo batch (single grid step; B too small to split across TCs).
    batch = 8
    x = jax.random.normal(k_x, (batch, input_dim), jnp.float32)
    ref = _reference_forward(x, raw_params)

    # Exact f32-matmul path: tight check against the PyTorch-equivalent reference.
    out_f32 = jax.block_until_ready(
        generator_forward(x, params, matmul_dtype=jnp.float32))
    assert out_f32.shape == (batch, output_dim)
    assert jnp.allclose(out_f32, ref, atol=1e-5, rtol=1e-5), "mismatch (f32 path)"

    # Default bf16-MXU path (f32 accumulate + f32 LN/tanh): looser tolerance.
    out_bf16 = jax.block_until_ready(generator_forward(x, params))
    assert out_bf16.shape == (batch, output_dim)
    assert jnp.allclose(out_bf16, ref, atol=5e-2, rtol=5e-2), "mismatch (bf16 path)"

    # Ragged batch exercising the multi-step parallel grid + padded-tail path.
    batch2 = 300
    x2 = jax.random.normal(k_x2, (batch2, input_dim), jnp.float32)
    out2 = jax.block_until_ready(
        generator_forward(x2, params, batch_tile=128, matmul_dtype=jnp.float32))
    ref2 = _reference_forward(x2, raw_params)
    assert out2.shape == (batch2, output_dim)
    assert jnp.allclose(out2, ref2, atol=1e-5, rtol=1e-5), "mismatch (ragged)"

    print("KERNEL_OK")
</pallas_src>

<mosaic_0001>
module attributes {stable_mosaic.version = 11 : i64} {
  func.func @_generator_kernel(%arg0: i32, %arg1: memref<8x32xf32, #tpu.memory_space<vmem>>, %arg2: memref<32x32xf32, #tpu.memory_space<vmem>>, %arg3: memref<1x32xf32, #tpu.memory_space<vmem>>, %arg4: memref<1x32xf32, #tpu.memory_space<vmem>>, %arg5: memref<32x32xf32, #tpu.memory_space<vmem>>, %arg6: memref<1x32xf32, #tpu.memory_space<vmem>>, %arg7: memref<1x32xf32, #tpu.memory_space<vmem>>, %arg8: memref<32x16xf32, #tpu.memory_space<vmem>>, %arg9: memref<1x16xf32, #tpu.memory_space<vmem>>, %arg10: memref<1x16xf32, #tpu.memory_space<vmem>>, %arg11: memref<8x16xf32, #tpu.memory_space<vmem>>) attributes {dimension_semantics = [#tpu.dimension_semantics<parallel>], iteration_bounds = array<i64: 1>, scalar_prefetch = 0 : i64, scratch_operands = 0 : i64, tpu.core_type = #tpu.core_type<tc>, window_params = [{transform_indices = @transform_0, window_bounds = array<i64: 8, 32>}, {pipeline_mode = #tpu.pipeline_mode<synchronous>, transform_indices = @transform_1, window_bounds = array<i64: 32, 32>}, {pipeline_mode = #tpu.pipeline_mode<synchronous>, transform_indices = @transform_2, window_bounds = array<i64: 1, 32>}, {pipeline_mode = #tpu.pipeline_mode<synchronous>, transform_indices = @transform_3, window_bounds = array<i64: 1, 32>}, {pipeline_mode = #tpu.pipeline_mode<synchronous>, transform_indices = @transform_4, window_bounds = array<i64: 32, 32>}, {pipeline_mode = #tpu.pipeline_mode<synchronous>, transform_indices = @transform_5, window_bounds = array<i64: 1, 32>}, {pipeline_mode = #tpu.pipeline_mode<synchronous>, transform_indices = @transform_6, window_bounds = array<i64: 1, 32>}, {pipeline_mode = #tpu.pipeline_mode<synchronous>, transform_indices = @transform_7, window_bounds = array<i64: 32, 16>}, {pipeline_mode = #tpu.pipeline_mode<synchronous>, transform_indices = @transform_8, window_bounds = array<i64: 1, 16>}, {pipeline_mode = #tpu.pipeline_mode<synchronous>, transform_indices = @transform_9, window_bounds = array<i64: 1, 16>}, {transform_indices = @transform_10, window_bounds = array<i64: 8, 16>}]} {
    %c0 = arith.constant 0 : index
    %c0_0 = arith.constant 0 : index
    %0 = vector.load %arg1[%c0, %c0_0] : memref<8x32xf32, #tpu.memory_space<vmem>>, vector<8x32xf32>
    %c0_1 = arith.constant 0 : index
    %c0_2 = arith.constant 0 : index
    %1 = vector.load %arg2[%c0_1, %c0_2] : memref<32x32xf32, #tpu.memory_space<vmem>>, vector<32x32xf32>
    %c0_3 = arith.constant 0 : index
    %c0_4 = arith.constant 0 : index
    %2 = vector.load %arg3[%c0_3, %c0_4] : memref<1x32xf32, #tpu.memory_space<vmem>>, vector<1x32xf32>
    %c0_5 = arith.constant 0 : index
    %c0_6 = arith.constant 0 : index
    %3 = vector.load %arg4[%c0_5, %c0_6] : memref<1x32xf32, #tpu.memory_space<vmem>>, vector<1x32xf32>
    %cst = arith.constant dense<0.000000e+00> : vector<8x32xf32>
    %4 = tpu.matmul %0, %1, %cst {dimension_numbers = #tpu.dot_dimension_numbers<[1], [0], [0], [1], [0, 0, 1, 1], [], []>} : vector<8x32xf32>, vector<32x32xf32>, vector<8x32xf32> -> vector<8x32xf32>
    %cst_7 = arith.constant dense<0.000000e+00> : vector<8xf32>
    %5 = vector.multi_reduction <add>, %4, %cst_7 [1] : vector<8x32xf32> to vector<8xf32>
    %6 = vector.shape_cast %5 : vector<8xf32> to vector<8x1xf32>
    %cst_8 = arith.constant 3.200000e+01 : f32
    %7 = vector.broadcast %cst_8 : f32 to vector<8x1xf32>
    %8 = arith.divf %6, %7 : vector<8x1xf32>
    %9 = vector.broadcast %8 : vector<8x1xf32> to vector<8x32xf32>
    %10 = arith.subf %4, %9 : vector<8x32xf32>
    %11 = arith.mulf %10, %10 : vector<8x32xf32>
    %cst_9 = arith.constant dense<0.000000e+00> : vector<8xf32>
    %12 = vector.multi_reduction <add>, %11, %cst_9 [1] : vector<8x32xf32> to vector<8xf32>
    %13 = vector.shape_cast %12 : vector<8xf32> to vector<8x1xf32>
    %cst_10 = arith.constant 3.200000e+01 : f32
    %14 = vector.broadcast %cst_10 : f32 to vector<8x1xf32>
    %15 = arith.divf %13, %14 : vector<8x1xf32>
    %cst_11 = arith.constant 9.99999974E-6 : f32
    %16 = vector.broadcast %cst_11 : f32 to vector<8x1xf32>
    %17 = arith.addf %15, %16 : vector<8x1xf32>
    %18 = math.rsqrt %17 : vector<8x1xf32>
    %19 = vector.broadcast %18 : vector<8x1xf32> to vector<8x32xf32>
    %20 = arith.mulf %10, %19 : vector<8x32xf32>
    %21 = vector.broadcast %2 : vector<1x32xf32> to vector<8x32xf32>
    %22 = arith.mulf %20, %21 : vector<8x32xf32>
    %23 = vector.broadcast %3 : vector<1x32xf32> to vector<8x32xf32>
    %24 = arith.addf %22, %23 : vector<8x32xf32>
    %25 = math.tanh %24 : vector<8x32xf32>
    %26 = arith.addf %25, %0 : vector<8x32xf32>
    %c0_12 = arith.constant 0 : index
    %c0_13 = arith.constant 0 : index
    %27 = vector.load %arg5[%c0_12, %c0_13] : memref<32x32xf32, #tpu.memory_space<vmem>>, vector<32x32xf32>
    %c0_14 = arith.constant 0 : index
    %c0_15 = arith.constant 0 : index
    %28 = vector.load %arg6[%c0_14, %c0_15] : memref<1x32xf32, #tpu.memory_space<vmem>>, vector<1x32xf32>
    %c0_16 = arith.constant 0 : index
    %c0_17 = arith.constant 0 : index
    %29 = vector.load %arg7[%c0_16, %c0_17] : memref<1x32xf32, #tpu.memory_space<vmem>>, vector<1x32xf32>
    %cst_18 = arith.constant dense<0.000000e+00> : vector<8x32xf32>
    %30 = tpu.matmul %26, %27, %cst_18 {dimension_numbers = #tpu.dot_dimension_numbers<[1], [0], [0], [1], [0, 0, 1, 1], [], []>} : vector<8x32xf32>, vector<32x32xf32>, vector<8x32xf32> -> vector<8x32xf32>
    %cst_19 = arith.constant dense<0.000000e+00> : vector<8xf32>
    %31 = vector.multi_reduction <add>, %30, %cst_19 [1] : vector<8x32xf32> to vector<8xf32>
    %32 = vector.shape_cast %31 : vector<8xf32> to vector<8x1xf32>
    %cst_20 = arith.constant 3.200000e+01 : f32
    %33 = vector.broadcast %cst_20 : f32 to vector<8x1xf32>
    %34 = arith.divf %32, %33 : vector<8x1xf32>
    %35 = vector.broadcast %34 : vector<8x1xf32> to vector<8x32xf32>
    %36 = arith.subf %30, %35 : vector<8x32xf32>
    %37 = arith.mulf %36, %36 : vector<8x32xf32>
    %cst_21 = arith.constant dense<0.000000e+00> : vector<8xf32>
    %38 = vector.multi_reduction <add>, %37, %cst_21 [1] : vector<8x32xf32> to vector<8xf32>
    %39 = vector.shape_cast %38 : vector<8xf32> to vector<8x1xf32>
    %cst_22 = arith.constant 3.200000e+01 : f32
    %40 = vector.broadcast %cst_22 : f32 to vector<8x1xf32>
    %41 = arith.divf %39, %40 : vector<8x1xf32>
    %cst_23 = arith.constant 9.99999974E-6 : f32
    %42 = vector.broadcast %cst_23 : f32 to vector<8x1xf32>
    %43 = arith.addf %41, %42 : vector<8x1xf32>
    %44 = math.rsqrt %43 : vector<8x1xf32>
    %45 = vector.broadcast %44 : vector<8x1xf32> to vector<8x32xf32>
    %46 = arith.mulf %36, %45 : vector<8x32xf32>
    %47 = vector.broadcast %28 : vector<1x32xf32> to vector<8x32xf32>
    %48 = arith.mulf %46, %47 : vector<8x32xf32>
    %49 = vector.broadcast %29 : vector<1x32xf32> to vector<8x32xf32>
    %50 = arith.addf %48, %49 : vector<8x32xf32>
    %51 = math.tanh %50 : vector<8x32xf32>
    %52 = arith.addf %51, %26 : vector<8x32xf32>
    %c0_24 = arith.constant 0 : index
    %c0_25 = arith.constant 0 : index
    %53 = vector.load %arg8[%c0_24, %c0_25] : memref<32x16xf32, #tpu.memory_space<vmem>>, vector<32x16xf32>
    %c0_26 = arith.constant 0 : index
    %c0_27 = arith.constant 0 : index
    %54 = vector.load %arg9[%c0_26, %c0_27] : memref<1x16xf32, #tpu.memory_space<vmem>>, vector<1x16xf32>
    %c0_28 = arith.constant 0 : index
    %c0_29 = arith.constant 0 : index
    %55 = vector.load %arg10[%c0_28, %c0_29] : memref<1x16xf32, #tpu.memory_space<vmem>>, vector<1x16xf32>
    %cst_30 = arith.constant dense<0.000000e+00> : vector<8x16xf32>
    %56 = tpu.matmul %52, %53, %cst_30 {dimension_numbers = #tpu.dot_dimension_numbers<[1], [0], [0], [1], [0, 0, 1, 1], [], []>} : vector<8x32xf32>, vector<32x16xf32>, vector<8x16xf32> -> vector<8x16xf32>
    %cst_31 = arith.constant dense<0.000000e+00> : vector<8xf32>
    %57 = vector.multi_reduction <add>, %56, %cst_31 [1] : vector<8x16xf32> to vector<8xf32>
    %58 = vector.shape_cast %57 : vector<8xf32> to vector<8x1xf32>
    %cst_32 = arith.constant 1.600000e+01 : f32
    %59 = vector.broadcast %cst_32 : f32 to vector<8x1xf32>
    %60 = arith.divf %58, %59 : vector<8x1xf32>
    %61 = vector.broadcast %60 : vector<8x1xf32> to vector<8x16xf32>
    %62 = arith.subf %56, %61 : vector<8x16xf32>
    %63 = arith.mulf %62, %62 : vector<8x16xf32>
    %cst_33 = arith.constant dense<0.000000e+00> : vector<8xf32>
    %64 = vector.multi_reduction <add>, %63, %cst_33 [1] : vector<8x16xf32> to vector<8xf32>
    %65 = vector.shape_cast %64 : vector<8xf32> to vector<8x1xf32>
    %cst_34 = arith.constant 1.600000e+01 : f32
    %66 = vector.broadcast %cst_34 : f32 to vector<8x1xf32>
    %67 = arith.divf %65, %66 : vector<8x1xf32>
    %cst_35 = arith.constant 9.99999974E-6 : f32
    %68 = vector.broadcast %cst_35 : f32 to vector<8x1xf32>
    %69 = arith.addf %67, %68 : vector<8x1xf32>
    %70 = math.rsqrt %69 : vector<8x1xf32>
    %71 = vector.broadcast %70 : vector<8x1xf32> to vector<8x16xf32>
    %72 = arith.mulf %62, %71 : vector<8x16xf32>
    %73 = vector.broadcast %54 : vector<1x16xf32> to vector<8x16xf32>
    %74 = arith.mulf %72, %73 : vector<8x16xf32>
    %75 = vector.broadcast %55 : vector<1x16xf32> to vector<8x16xf32>
    %76 = arith.addf %74, %75 : vector<8x16xf32>
    %77 = math.tanh %76 : vector<8x16xf32>
    %c0_36 = arith.constant 0 : index
    %c0_37 = arith.constant 0 : index
    %78 = vector.load %arg11[%c0_36, %c0_37] : memref<8x16xf32, #tpu.memory_space<vmem>>, vector<8x16xf32>
    tpu.vector_store %arg11[%c0_36, %c0_37], %77 {strides = array<i32>} : memref<8x16xf32, #tpu.memory_space<vmem>>, vector<8x16xf32>,
    return
  }
  func.func @transform_0(%arg0: i32) -> (i32, i32) {
    %c0_i32 = arith.constant 0 : i32
    %c0_i32_0 = arith.constant 0 : i32
    return %arg0, %c0_i32 : i32, i32
  }
  func.func @transform_1(%arg0: i32) -> (i32, i32) {
    %c0_i32 = arith.constant 0 : i32
    %c0_i32_0 = arith.constant 0 : i32
    %c0_i32_1 = arith.constant 0 : i32
    return %c0_i32, %c0_i32_0 : i32, i32
  }
  func.func @transform_2(%arg0: i32) -> (i32, i32) {
    %c0_i32 = arith.constant 0 : i32
    %c0_i32_0 = arith.constant 0 : i32
    %c0_i32_1 = arith.constant 0 : i32
    return %c0_i32, %c0_i32_0 : i32, i32
  }
  func.func @transform_3(%arg0: i32) -> (i32, i32) {
    %c0_i32 = arith.constant 0 : i32
    %c0_i32_0 = arith.constant 0 : i32
    %c0_i32_1 = arith.constant 0 : i32
    return %c0_i32, %c0_i32_0 : i32, i32
  }
  func.func @transform_4(%arg0: i32) -> (i32, i32) {
    %c0_i32 = arith.constant 0 : i32
    %c0_i32_0 = arith.constant 0 : i32
    %c0_i32_1 = arith.constant 0 : i32
    return %c0_i32, %c0_i32_0 : i32, i32
  }
  func.func @transform_5(%arg0: i32) -> (i32, i32) {
    %c0_i32 = arith.constant 0 : i32
    %c0_i32_0 = arith.constant 0 : i32
    %c0_i32_1 = arith.constant 0 : i32
    return %c0_i32, %c0_i32_0 : i32, i32
  }
  func.func @transform_6(%arg0: i32) -> (i32, i32) {
    %c0_i32 = arith.constant 0 : i32
    %c0_i32_0 = arith.constant 0 : i32
    %c0_i32_1 = arith.constant 0 : i32
    return %c0_i32, %c0_i32_0 : i32, i32
  }
  func.func @transform_7(%arg0: i32) -> (i32, i32) {
    %c0_i32 = arith.constant 0 : i32
    %c0_i32_0 = arith.constant 0 : i32
    %c0_i32_1 = arith.constant 0 : i32
    return %c0_i32, %c0_i32_0 : i32, i32
  }
  func.func @transform_8(%arg0: i32) -> (i32, i32) {
    %c0_i32 = arith.constant 0 : i32
    %c0_i32_0 = arith.constant 0 : i32
    %c0_i32_1 = arith.constant 0 : i32
    return %c0_i32, %c0_i32_0 : i32, i32
  }
  func.func @transform_9(%arg0: i32) -> (i32, i32) {
    %c0_i32 = arith.constant 0 : i32
    %c0_i32_0 = arith.constant 0 : i32
    %c0_i32_1 = arith.constant 0 : i32
    return %c0_i32, %c0_i32_0 : i32, i32
  }
  func.func @transform_10(%arg0: i32) -> (i32, i32) {
    %c0_i32 = arith.constant 0 : i32
    %c0_i32_0 = arith.constant 0 : i32
    return %arg0, %c0_i32 : i32, i32
  }
}

</mosaic_0001>

<bundles_post_ra>
// kernel: tpu_custom_call.1
= control target key start
LH: loop header
LB: loop body
LE: loop exit
PB: predicated region body
PF: predicated region fallthrough
CT: control target
= control target key end

     0   :  { %15 = vsyncpa [#allocation3], 0  ;;  %s686_s0 = inlined_call_operand.vmem [shape: f32[8,32], index: 0, kind: input, shape index: {}]   ;;  %s687_s1 = inlined_call_operand.vmem [shape: f32[32,32], index: 1, kind: input, shape index: {}]   ;;  %s688_s2 = inlined_call_operand.vmem [shape: f32[1,32], index: 2, kind: input, shape index: {}]   ;;  %s689_s3 = inlined_call_operand.vmem [shape: f32[1,32], index: 3, kind: input, shape index: {}]   ;;  %s690_s4 = inlined_call_operand.hbm [shape: f32[32,32], index: 4, kind: input, shape index: {}]   ;;  %s691_s5 = inlined_call_operand.vmem [shape: f32[1,32], index: 5, kind: input, shape index: {}]   ;;  %s692_s6 = inlined_call_operand.vmem [shape: f32[1,32], index: 6, kind: input, shape index: {}]   ;;  %s693_s7 = inlined_call_operand.vmem [shape: f32[32,16], index: 7, kind: input, shape index: {}]   ;;  %s694_s8 = inlined_call_operand.vmem [shape: f32[1,16], index: 8, kind: input, shape index: {}]   ;;  %s695_s9 = inlined_call_operand.vmem [shape: f32[1,16], index: 9, kind: input, shape index: {}]   ;;  %s696_s10 = inlined_call_operand.hbm [shape: f32[8,16], index: 10, kind: output, shape index: {}]  }
   0x1   :  { %16 = vsyncpa [#allocation4], 0  ;;  %s536_s13 = smov [#allocation2]   ;;  %s488_s17 = scalar_lea.hbm %s690_s4, 512 }
   0x2   :  { %s30_s14 = sshll.u32 %s536_s13, 4  ;;  %p489_p0 = scmp.ne.s32.totalorder %s690_s4, %s488_s17  ;;  %s31_s14 = int_to_ptr.vmem [resolvable:$true] %s30_s14 }
   0x3   :  { %p492_p1 = scmp.lt.u32.totalorder %s488_s17, %s690_s4 }
   0x5   :  { %p494_p2 = pnand %p492_p1, %p489_p0 }
   0x7   :  { %497 = shalt.err (!%p494_p2)
}
   0x8   :  { %s498_s22 = scalar_lea.vmem %s31_s14, 512  ;;  %p503_p4 = scmp.lt.s32.totalorder %s31_s14, %s31_s14 }
   0x9   :  { %p499_p3 = scmp.ne.s32.totalorder %s31_s14, %s498_s22  ;;  %p504_p5 = scmp.lt.s32.totalorder %s498_s22, %s498_s22 }
   0xb   :  { %p505_p6 = por %p504_p5, %p503_p4 }
   0xd   :  { %p506_p7 = pnand %p505_p6, %p499_p3 }
   0xf   :  { %509 = shalt.err (!%p506_p7)
}
  0x10   :  { %s537_s23 = smov 128   ;;  %s538_s24 = smov 8  }
  0x11   :  { %36 = dma.hbm_to_vmem [thread:$0]  %s690_s4, 512, %s31_s14, [#allocation3], %s537_s23, %s537_s23, %s538_s24  }
  0x12   :  { %532 = dma.done.wait [#allocation3], 512  }
  0x13   :  { %533 = vsyncadd [#allocation3], 4294966784  ;;  %v539_v0 = vmov 0.0|0.0   ;;  %vm540_vm0 = vmmov 0   ;;  %v541_v1 = vmov 0.0   ;;  %v51_v2 = vld [vmem:[%s687_s1] sm:$0xff] }
  0x14   :  { %451 = vmatprep.subr.bf16.mxu0 %v539_v0  ;;  %426 = vmatprep.mubr.msk.f32.mxu0 %vm540_vm0, %v541_v1  ;;  %v52_v3 = vld [vmem:[%s687_s1 + $0x8] sm:$0xff]  ;;  %v53_v4 = vld [vmem:[%s687_s1 + $0x10] sm:$0xff]  ;;  %v54_v6 = vld [vmem:[%s687_s1 + $0x18] sm:$0xff]  ;;  %vm57_vm1 = vcmask 261120   ;;  %vm348_vm2 = vcmask 130048   ;;  %s542_s29 = smov [#allocation5]  }
  0x15   :  { %457 = vmatprep.subr.bf16.mxu1 %v539_v0  ;;  %437 = vmatprep.mubr.msk.f32.mxu1 %vm540_vm0, %v541_v1  ;;  %v452_v5 = vpack.c.bf16 %v52_v3, %v51_v2  ;;  %v455_v7 = vpack.c.bf16 %v54_v6, %v53_v4  ;;  %v50_v8 = vld [vmem:[%s686_s0] sm:$0xff]  ;;  %v162_v18 = vld [vmem:[#allocation2 + $0x8] sm:$0xff]  ;;  %v163_v19 = vld [vmem:[#allocation2 + $0x10] sm:$0xff]  ;;  %s385_s30 = sshll.u32 %s542_s29, 4  ;;  %s386_s30 = int_to_ptr.vmem [resolvable:$true] %s385_s30 }
  0x16   :  { %v161_v17 = vld [vmem:[#allocation2] sm:$0xff]  ;;  %v164_v21 = vld [vmem:[#allocation2 + $0x18] sm:$0xff]  ;;  %v270_v43 = vld [vmem:[%s693_s7 + $0x8] sm:$0xff]  ;;  %s510_s4 = scalar_lea.vmem %s386_s30, 128  ;;  %p515_p9 = scmp.lt.s32.totalorder %s386_s30, %s386_s30 }
  0x17   :  { %453 = vmatpush3.bf16.msra.mxu0 %v452_v5  ;;  %v458_v20 = vpack.c.bf16 %v162_v18, %v161_v17  ;;  %v461_v22 = vpack.c.bf16 %v164_v21, %v163_v19  ;;  %v395_v27 = vld [vmem:[%s688_s2] ss:$0 sm:$0xff]  ;;  %v271_v44 = vld [vmem:[%s693_s7 + $0x10] sm:$0xff]  ;;  %v272_v46 = vld [vmem:[%s693_s7 + $0x18] sm:$0xff]  ;;  %p511_p8 = scmp.ne.s32.totalorder %s386_s30, %s510_s4  ;;  %p516_p10 = scmp.lt.s32.totalorder %s510_s4, %s510_s4 }
  0x18   :  { %454 = vmatprep.subr.bf16.mxu0 %v539_v0  ;;  %v396_v29 = vld [vmem:[%s689_s3] ss:$0 sm:$0xff]  ;;  %v467_v47 = vpack.c.bf16 %v272_v46, %v271_v44 }
  0x19   :  { %459 = vmatpush3.bf16.msra.mxu1 %v458_v20  ;;  %v269_v42 = vld [vmem:[%s693_s7] sm:$0xff]  ;;  %p517_p11 = por %p516_p10, %p515_p9 }
  0x1a   :  { %460 = vmatprep.subr.bf16.mxu1 %v539_v0  ;;  %v464_v45 = vpack.c.bf16 %v270_v43, %v269_v42  ;;  %v398_v52 = vld [vmem:[%s691_s5] ss:$0 sm:$0xff] }
  0x1b   :  { %456 = vmatpush3.bf16.msra.mxu0 %v455_v7  ;;  %v399_v54 = vld [vmem:[%s692_s6] ss:$0 sm:$0xff]  ;;  %p518_p12 = pnand %p517_p11, %p511_p8 }
  0x1c   :  { %463 = vmatprep.subr.bf16.mxu0 %v539_v0  ;;  %v401_v7 = vld [vmem:[%s694_s8] ss:$0 sm:$0xff] }
  0x1d   :  { %462 = vmatpush3.bf16.msra.mxu1 %v461_v22 }
  0x1e   :  { %427 = vmatmul.mubr.msk.f32.vlgmr.msra.gmra.mrb[0].mxu0 %vm57_vm1, %v50_v8 }
  0x1f   :  { %448 = vmatprep.mubr.msk.f32.mxu0 %vm540_vm0, %v541_v1  ;;  %465 = vmatpush3.bf16.msra.mxu0 %v464_v45 }
  0x20   :  { %466 = vmatprep.subr.bf16.mxu0 %v539_v0 }
  0x23   :  { %468 = vmatpush3.bf16.msra.mxu0 %v467_v47 }
  0xf1   :  { %v127_v9 = vpop.f32.mrb[0].mxu0 }
  0xf2   :  { %v428_v10 = vpop.f32.mrb[1].mxu0  ;;  %v131_v11 = vsel %vm57_vm1, %v127_v9, 0.0 }
  0xf3   :  { %132 = vadd.xlane.f32.xlu0 %v131_v11 }
 0x180   :  { %v133_v12 = vpop.xlane.xlu0 %132 }
 0x181   :  { %v135_v13 = vmul.f32 0.03125, %v133_v12 }
 0x183   :  { %v136_v14 = vsub.f32 %v127_v9, %v135_v13  ;;  %v402_v9 = vld [vmem:[%s695_s9] ss:$0 sm:$0xff] }
 0x185   :  { %v137_v15 = vmul.f32 %v136_v14, %v136_v14 }
 0x187   :  { %v138_v16 = vsel %vm57_vm1, %v137_v15, 0.0 }
 0x188   :  { %139 = vadd.xlane.f32.xlu0 %v138_v16 }
 0x215   :  { %v140_v23 = vpop.xlane.xlu0 %139 }
 0x216   :  { %v141_v24 = vmul.f32 0.03125, %v140_v23 }
 0x218   :  { %v142_v25 = vadd.f32 1e-05, %v141_v24 }
 0x21a   :  { %476 = vrsqrt.f32 %v142_v25 }
 0x224   :  { %v477_v26 = vpop.eup %476 }
 0x225   :  { %v144_v28 = vmul.f32 %v477_v26, %v136_v14 }
 0x227   :  { %v151_v30 = vmul.f32 %v395_v27, %v144_v28 }
 0x229   :  { %v158_v31 = vadd.f32 %v396_v29, %v151_v30 }
 0x22b   :  { %478 = vtanh.f32 %v158_v31 }
 0x235   :  { %v479_v32 = vpop.eup %478 }
 0x236   :  { %v160_v33 = vadd.f32 %v479_v32, %v50_v8 }
 0x238   :  { %438 = vmatmul.mubr.msk.f32.vlgmr.msra.gmra.mrb[0].mxu1 %vm57_vm1, %v160_v33 }
 0x30b   :  { %v236_v34 = vpop.f32.mrb[0].mxu1 }
 0x30c   :  { %v439_v35 = vpop.f32.mrb[1].mxu1  ;;  %v240_v36 = vsel %vm57_vm1, %v236_v34, 0.0 }
 0x30d   :  { %241 = vadd.xlane.f32.xlu1 %v240_v36 }
 0x39a   :  { %v242_v37 = vpop.xlane.xlu1 %241 }
 0x39b   :  { %v243_v38 = vmul.f32 0.03125, %v242_v37 }
 0x39d   :  { %v244_v39 = vsub.f32 %v236_v34, %v243_v38 }
 0x39f   :  { %v245_v40 = vmul.f32 %v244_v39, %v244_v39 }
 0x3a1   :  { %v246_v41 = vsel %vm57_vm1, %v245_v40, 0.0 }
 0x3a2   :  { %247 = vadd.xlane.f32.xlu1 %v246_v41 }
 0x42f   :  { %v248_v48 = vpop.xlane.xlu1 %247 }
 0x430   :  { %v249_v49 = vmul.f32 0.03125, %v248_v48 }
 0x432   :  { %v250_v50 = vadd.f32 1e-05, %v249_v49 }
 0x434   :  { %480 = vrsqrt.f32 %v250_v50 }
 0x43e   :  { %v481_v51 = vpop.eup %480 }
 0x43f   :  { %v252_v53 = vmul.f32 %v481_v51, %v244_v39 }
 0x441   :  { %v259_v55 = vmul.f32 %v398_v52, %v252_v53 }
 0x443   :  { %v266_v56 = vadd.f32 %v399_v54, %v259_v55 }
 0x445   :  { %482 = vtanh.f32 %v266_v56 }
 0x44f   :  { %v483_v57 = vpop.eup %482 }
 0x450   :  { %v268_v58 = vadd.f32 %v483_v57, %v160_v33 }
 0x452   :  { %449 = vmatmul.mubr.msk.f32.vlgmr.msra.gmra.mrb[2].mxu0 %vm57_vm1, %v268_v58 }
 0x525   :  { %v344_v59 = vpop.f32.mrb[2].mxu0 }
 0x526   :  { %v450_v60 = vpop.f32.mrb[3].mxu0  ;;  %v349_v61 = vsel %vm348_vm2, %v344_v59, 0.0 }
 0x527   :  { %350 = vadd.xlane.f32.xlu0 %v349_v61 }
 0x5b4   :  { %v351_v62 = vpop.xlane.xlu0 %350 }
 0x5b5   :  { %v353_v63 = vmul.f32 0.0625, %v351_v62 }
 0x5b7   :  { %v354_v0 = vsub.f32 %v344_v59, %v353_v63 }
 0x5b9   :  { %v355_v1 = vmul.f32 %v354_v0, %v354_v0 }
 0x5bb   :  { %v356_v2 = vsel %vm348_vm2, %v355_v1, 0.0 }
 0x5bc   :  { %357 = vadd.xlane.f32.xlu1 %v356_v2 }
 0x649   :  { %v358_v3 = vpop.xlane.xlu1 %357 }
 0x64a   :  { %v359_v4 = vmul.f32 0.0625, %v358_v3 }
 0x64c   :  { %v360_v5 = vadd.f32 1e-05, %v359_v4 }
 0x64e   :  { %484 = vrsqrt.f32 %v360_v5 }
 0x658   :  { %v485_v6 = vpop.eup %484 }
 0x659   :  { %v362_v8 = vmul.f32 %v485_v6, %v354_v0 }
 0x65b   :  { %v369_v10 = vmul.f32 %v401_v7, %v362_v8 }
 0x65d   :  { %v376_v11 = vadd.f32 %v402_v9, %v369_v10 }
 0x65f   :  { %486 = vtanh.f32 %v376_v11 }
 0x669   :  { %v487_v12 = vpop.eup %486 }
 0x66a   :  { %378 = vst.msk [vmem:[#allocation5] sm:$0xff] %vm348_vm2, %v487_v12 }
 0x66b   :  { %521 = shalt.err (!%p518_p12)
}
 0x66c   :  { %s522_s9 = scalar_lea.hbm %s696_s10, 128 }
 0x66d   :  { %p523_p13 = scmp.ne.s32.totalorder %s696_s10, %s522_s9  ;;  %p526_p0 = scmp.lt.u32.totalorder %s522_s9, %s696_s10 }
 0x66f   :  { %p528_p1 = pnand %p526_p0, %p523_p13 }
 0x671   :  { %531 = shalt.err (!%p528_p1)
}
 0x672   :  { %388 = dma.vmem_to_hbm [thread:$0]  %s386_s30, 128, %s696_s10, [#allocation4]  }
 0x673   :  { %534 = dma.done.wait [#allocation4], 128  }
 0x674   :  { %535 = vsyncadd [#allocation4], 4294967168 }
 0x675   :  { %392 = vsyncpa [#allocation3], 1 }
 0x676   :  { %393 = vsyncpa [#allocation4], 1 }

</bundles_post_ra>
